<compile_context>
chip_gen: v5e
topology: v5e:2x2
jax: 0.10.0
libtpu: 0.0.40
codegen_flags: <defaults>
</compile_context>

<pallas_src>
import jax
import jax.numpy as jnp
from jax.experimental import pallas as pl
from jax.experimental.pallas import tpu as pltpu


# ---------------------------- Pallas kernels ----------------------------

def _conv_matmul_kernel(w_ref, p_ref, o_ref):
    # (Cout, 9*Cin) @ (9*Cin, tn) -> (Cout, tn); lane-dense store (tn % 128 == 0).
    o_ref[...] = jnp.dot(w_ref[...], p_ref[...],
                         preferred_element_type=jnp.float32).astype(o_ref.dtype)


def conv_matmul_lane_dense(w2, patches, tn=256):
    """w2: (Cout, K), patches: (K, M) -> (Cout, M).  Tiled over M (parallel)."""
    Cout, K = w2.shape
    _, M = patches.shape
    if M % tn != 0:          # fall back to a single block if M is not tileable
        tn = M
    return pl.pallas_call(
        _conv_matmul_kernel,
        out_shape=jax.ShapeDtypeStruct((Cout, M), jnp.float32),
        grid=(M // tn,),
        in_specs=[
            pl.BlockSpec((Cout, K), lambda i: (0, 0)),
            pl.BlockSpec((K, tn), lambda i: (0, i)),
        ],
        out_specs=pl.BlockSpec((Cout, tn), lambda i: (0, i)),
        compiler_params=pltpu.CompilerParams(
            dimension_semantics=("parallel",)),
    )(w2, patches)


def _affine_kernel(x_ref, scale_ref, shift_ref, o_ref):
    # Per-channel affine (BatchNorm eval mode) on a channels-first (C, M) slab.
    o_ref[...] = x_ref[...] * scale_ref[...] + shift_ref[...]


def affine_channels_first(x_cf, scale_col, shift_col):
    """x_cf: (C, M) lane-dense slab; scale/shift: (C, 1)."""
    return pl.pallas_call(
        _affine_kernel,
        out_shape=jax.ShapeDtypeStruct(x_cf.shape, x_cf.dtype),
    )(x_cf, scale_col, shift_col)


def _relu_kernel(x_ref, o_ref):
    o_ref[...] = jnp.maximum(x_ref[...], 0.0)


def relu_lane_dense(x2d):
    """ReLU on a 2D slab with a 128-multiple last dim (here (16, 256))."""
    return pl.pallas_call(
        _relu_kernel,
        out_shape=jax.ShapeDtypeStruct(x2d.shape, x2d.dtype),
    )(x2d)


def _row_mean_kernel(x_ref, o_ref):
    o_ref[...] = jnp.mean(x_ref[...], axis=-1, keepdims=True)


def row_mean(x2d):
    """(R, K) -> (R, 1) mean over the lane axis (global average pool)."""
    R, _ = x2d.shape
    return pl.pallas_call(
        _row_mean_kernel,
        out_shape=jax.ShapeDtypeStruct((R, 1), x2d.dtype),
    )(x2d)


def _linear_kernel(x_ref, w_ref, b_ref, o_ref):
    o_ref[...] = (jnp.dot(x_ref[...], w_ref[...],
                          preferred_element_type=jnp.float32)
                  + b_ref[...]).astype(o_ref.dtype)


def linear_pallas(x, w_io, b_row):
    """nn.Linear with pre-transposed weight: x (N, in) @ w_io (in, out) + b."""
    N = x.shape[0]
    Dout = w_io.shape[1]
    return pl.pallas_call(
        _linear_kernel,
        out_shape=jax.ShapeDtypeStruct((N, Dout), jnp.float32),
    )(x, w_io, b_row)


# -------------------- Module wrappers (NCHW interface) --------------------

def conv2d_3x3_same(x_nchw, w2):
    """Conv2d(Cin, Cout, k=3, s=1, p=1, bias=False).

    w2 is the conv weight pre-reshaped to (Cout, 9*Cin) with (kh, kw, cin)
    ordering on the K axis.  The patch slab is built channels-first so the
    Pallas matmul stores a lane-dense (Cout, N*H*W) result.
    """
    N, Cin, H, W = x_nchw.shape
    Cout = w2.shape[0]
    x_cf = jnp.transpose(x_nchw, (1, 0, 2, 3))                 # (Cin, N, H, W)
    xp = jnp.pad(x_cf, ((0, 0), (0, 0), (1, 1), (1, 1)))       # spatial pad only
    patches = jnp.stack(
        [xp[:, :, i:i + H, j:j + W] for i in range(3) for j in range(3)],
        axis=0).reshape(9 * Cin, N * H * W)                    # K-major (kh,kw,cin)
    y_t = conv_matmul_lane_dense(w2, patches)                  # (Cout, N*H*W)
    return jnp.transpose(y_t.reshape(Cout, N, H, W), (1, 0, 2, 3))


def batchnorm2d(x_nchw, scale_col, shift_col):
    """BatchNorm2d eval mode: y = x * scale + shift, per channel."""
    N, C, H, W = x_nchw.shape
    x_cf = jnp.transpose(x_nchw, (1, 0, 2, 3)).reshape(C, N * H * W)
    y_cf = affine_channels_first(x_cf, scale_col, shift_col)
    return jnp.transpose(y_cf.reshape(C, N, H, W), (1, 0, 2, 3))


def relu_nchw(x_nchw):
    N, C, H, W = x_nchw.shape
    return relu_lane_dense(x_nchw.reshape(N * C, H * W)).reshape(N, C, H, W)


def adaptive_avgpool_1x1(x_nchw):
    """AdaptiveAvgPool2d(1): (N, C, H, W) -> (N, C, 1, 1)."""
    N, C, H, W = x_nchw.shape
    y = row_mean(x_nchw.reshape(N * C, H * W))                 # (N*C, 1)
    return y.reshape(N, C, 1, 1)


# ------------------ Submodule + FeatureExtractor (JAX port) ------------------

def make_tiny_resnet(key, cin=4, cmid=8, num_classes=10):
    """Deterministic synthetic ResNet-stem-like submodule.

    Returns (ordered {name: callable}, raw-parameter dict for reference checks).
    All parameter layout shuffles (weight reshape/transpose, BN fold) happen
    once here, not per forward.
    """
    k1, k2, k3 = jax.random.split(key, 3)
    conv_w = 0.1 * jax.random.normal(k1, (cmid, cin, 3, 3), jnp.float32)
    gamma = jnp.ones((cmid,), jnp.float32)
    beta = jnp.zeros((cmid,), jnp.float32)
    running_mean = jnp.zeros((cmid,), jnp.float32)
    running_var = jnp.ones((cmid,), jnp.float32)
    eps = 1e-5
    scale1d = gamma / jnp.sqrt(running_var + eps)
    shift1d = beta - running_mean * scale1d
    fc_w = 0.1 * jax.random.normal(k2, (num_classes, cmid), jnp.float32)
    fc_b = 0.1 * jax.random.normal(k3, (num_classes,), jnp.float32)

    # Pre-folded / pre-transposed layouts used by the Pallas kernels:
    conv_w2 = jnp.transpose(conv_w, (0, 2, 3, 1)).reshape(cmid, 9 * cin)
    bn_scale = scale1d.reshape(cmid, 1)
    bn_shift = shift1d.reshape(cmid, 1)
    fc_w_io = jnp.transpose(fc_w)                 # (in, out)
    fc_b_row = fc_b.reshape(1, num_classes)

    modules = {
        'conv1': lambda x: conv2d_3x3_same(x, conv_w2),
        'bn1': lambda x: batchnorm2d(x, bn_scale, bn_shift),
        'relu': relu_nchw,
        'avgpool': adaptive_avgpool_1x1,
        'fc': lambda x: linear_pallas(x, fc_w_io, fc_b_row),
    }
    params = dict(conv_w=conv_w, bn_scale=scale1d, bn_shift=shift1d,
                  fc_w=fc_w, fc_b=fc_b)
    return modules, params


class FeatureExtractor:
    """Faithful port of the PyTorch FeatureExtractor.forward (whole forward jitted)."""

    def __init__(self, submodule, extracted_layers):
        self.submodule = submodule          # ordered mapping name -> module callable
        self.extracted_layers = extracted_layers
        self._forward = jax.jit(self._forward_impl)

    def _forward_impl(self, x):
        outputs = []
        for name, module in self.submodule.items():
            if name == 'fc':
                x = x.reshape(x.shape[0], -1)   # x.view(x.size(0), -1)
            x = module(x)
            if name in self.extracted_layers:
                outputs.append(x)
        return outputs

    def __call__(self, x):
        return self._forward(x)


# ------------------------------ reference ------------------------------

def _reference_forward(x, p):
    """Pure-XLA reference of the same forward, for a numerical sanity check."""
    conv_out = jax.lax.conv_general_dilated(
        x, p['conv_w'], window_strides=(1, 1), padding=((1, 1), (1, 1)),
        dimension_numbers=('NCHW', 'OIHW', 'NCHW'),
        precision=jax.lax.Precision.HIGHEST)
    y = conv_out * p['bn_scale'].reshape(1, -1, 1, 1) + p['bn_shift'].reshape(1, -1, 1, 1)
    relu_out = jnp.maximum(y, 0.0)
    pooled = jnp.mean(relu_out, axis=(2, 3))
    fc_out = pooled @ p['fc_w'].T + p['fc_b']
    return [conv_out, relu_out, fc_out]


if __name__ == "__main__":
    key = jax.random.PRNGKey(0)
    k_in, k_params = jax.random.split(key)
    # NCHW input, same convention as the PyTorch module.
    x = jax.random.normal(k_in, (2, 4, 16, 16), jnp.float32)

    submodule, params = make_tiny_resnet(k_params, cin=4, cmid=8, num_classes=10)
    extractor = FeatureExtractor(submodule, extracted_layers=['conv1', 'relu', 'fc'])

    outs = extractor(x)
    outs = jax.block_until_ready(outs)

    expected_shapes = [(2, 8, 16, 16), (2, 8, 16, 16), (2, 10)]
    got_shapes = [tuple(o.shape) for o in outs]
    assert got_shapes == expected_shapes, got_shapes

    # Numerical sanity check against the pure-XLA reference (f32, loose tol for
    # MXU vs. XLA conv accumulation differences).
    refs = _reference_forward(x, params)
    for got, ref in zip(outs, refs):
        assert bool(jnp.allclose(got, ref, rtol=1e-2, atol=1e-2)), (
            float(jnp.max(jnp.abs(got - ref))))

    print("KERNEL_OK")
</pallas_src>

<mosaic_0001>
module attributes {stable_mosaic.version = 11 : i64} {
  func.func @_conv_matmul_kernel(%arg0: i32, %arg1: memref<8x36xf32, #tpu.memory_space<vmem>>, %arg2: memref<36x256xf32, #tpu.memory_space<vmem>>, %arg3: memref<8x256xf32, #tpu.memory_space<vmem>>) attributes {dimension_semantics = [#tpu.dimension_semantics<parallel>], iteration_bounds = array<i64: 2>, scalar_prefetch = 0 : i64, scratch_operands = 0 : i64, tpu.core_type = #tpu.core_type<tc>, window_params = [{pipeline_mode = #tpu.pipeline_mode<synchronous>, transform_indices = @transform_0, window_bounds = array<i64: 8, 36>}, {transform_indices = @transform_1, window_bounds = array<i64: 36, 256>}, {transform_indices = @transform_2, window_bounds = array<i64: 8, 256>}]} {
    %c0 = arith.constant 0 : index
    %c0_0 = arith.constant 0 : index
    %0 = vector.load %arg1[%c0, %c0_0] : memref<8x36xf32, #tpu.memory_space<vmem>>, vector<8x36xf32>
    %c0_1 = arith.constant 0 : index
    %c0_2 = arith.constant 0 : index
    %1 = vector.load %arg2[%c0_1, %c0_2] : memref<36x256xf32, #tpu.memory_space<vmem>>, vector<36x256xf32>
    %cst = arith.constant dense<0.000000e+00> : vector<8x256xf32>
    %2 = tpu.matmul %0, %1, %cst {dimension_numbers = #tpu.dot_dimension_numbers<[1], [0], [0], [1], [0, 0, 1, 1], [], []>} : vector<8x36xf32>, vector<36x256xf32>, vector<8x256xf32> -> vector<8x256xf32>
    %c0_3 = arith.constant 0 : index
    %c0_4 = arith.constant 0 : index
    %3 = vector.load %arg3[%c0_3, %c0_4] : memref<8x256xf32, #tpu.memory_space<vmem>>, vector<8x256xf32>
    tpu.vector_store %arg3[%c0_3, %c0_4], %2 {strides = array<i32>} : memref<8x256xf32, #tpu.memory_space<vmem>>, vector<8x256xf32>,
    return
  }
  func.func @transform_0(%arg0: i32) -> (i32, i32) {
    %c0_i32 = arith.constant 0 : i32
    %c0_i32_0 = arith.constant 0 : i32
    %c0_i32_1 = arith.constant 0 : i32
    return %c0_i32, %c0_i32_0 : i32, i32
  }
  func.func @transform_1(%arg0: i32) -> (i32, i32) {
    %c0_i32 = arith.constant 0 : i32
    %c0_i32_0 = arith.constant 0 : i32
    return %c0_i32, %arg0 : i32, i32
  }
  func.func @transform_2(%arg0: i32) -> (i32, i32) {
    %c0_i32 = arith.constant 0 : i32
    %c0_i32_0 = arith.constant 0 : i32
    return %c0_i32, %arg0 : i32, i32
  }
}

module attributes {stable_mosaic.version = 11 : i64} {
  func.func @_affine_kernel(%arg0: memref<8x512xf32, #tpu.memory_space<vmem>>, %arg1: memref<8x1xf32, #tpu.memory_space<vmem>>, %arg2: memref<8x1xf32, #tpu.memory_space<vmem>>, %arg3: memref<8x512xf32, #tpu.memory_space<vmem>>) attributes {dimension_semantics = [], scalar_prefetch = 0 : i64, scratch_operands = 0 : i64, tpu.core_type = #tpu.core_type<tc>} {
    %c0 = arith.constant 0 : index
    %c0_0 = arith.constant 0 : index
    %0 = vector.load %arg0[%c0, %c0_0] : memref<8x512xf32, #tpu.memory_space<vmem>>, vector<8x512xf32>
    %c0_1 = arith.constant 0 : index
    %c0_2 = arith.constant 0 : index
    %1 = vector.load %arg1[%c0_1, %c0_2] : memref<8x1xf32, #tpu.memory_space<vmem>>, vector<8x1xf32>
    %2 = vector.broadcast %1 : vector<8x1xf32> to vector<8x512xf32>
    %3 = arith.mulf %0, %2 : vector<8x512xf32>
    %c0_3 = arith.constant 0 : index
    %c0_4 = arith.constant 0 : index
    %4 = vector.load %arg2[%c0_3, %c0_4] : memref<8x1xf32, #tpu.memory_space<vmem>>, vector<8x1xf32>
    %5 = vector.broadcast %4 : vector<8x1xf32> to vector<8x512xf32>
    %6 = arith.addf %3, %5 : vector<8x512xf32>
    %c0_5 = arith.constant 0 : index
    %c0_6 = arith.constant 0 : index
    %7 = vector.load %arg3[%c0_5, %c0_6] : memref<8x512xf32, #tpu.memory_space<vmem>>, vector<8x512xf32>
    tpu.vector_store %arg3[%c0_5, %c0_6], %6 {strides = array<i32>} : memref<8x512xf32, #tpu.memory_space<vmem>>, vector<8x512xf32>,
    return
  }
}

module attributes {stable_mosaic.version = 11 : i64} {
  func.func @_relu_kernel(%arg0: memref<16x256xf32, #tpu.memory_space<vmem>>, %arg1: memref<16x256xf32, #tpu.memory_space<vmem>>) attributes {dimension_semantics = [], scalar_prefetch = 0 : i64, scratch_operands = 0 : i64, tpu.core_type = #tpu.core_type<tc>} {
    %c0 = arith.constant 0 : index
    %c0_0 = arith.constant 0 : index
    %0 = vector.load %arg0[%c0, %c0_0] : memref<16x256xf32, #tpu.memory_space<vmem>>, vector<16x256xf32>
    %cst = arith.constant 0.000000e+00 : f32
    %1 = vector.broadcast %cst : f32 to vector<16x256xf32>
    %2 = arith.maximumf %0, %1 : vector<16x256xf32>
    %c0_1 = arith.constant 0 : index
    %c0_2 = arith.constant 0 : index
    %3 = vector.load %arg1[%c0_1, %c0_2] : memref<16x256xf32, #tpu.memory_space<vmem>>, vector<16x256xf32>
    tpu.vector_store %arg1[%c0_1, %c0_2], %2 {strides = array<i32>} : memref<16x256xf32, #tpu.memory_space<vmem>>, vector<16x256xf32>,
    return
  }
}

module attributes {stable_mosaic.version = 11 : i64} {
  func.func @_row_mean_kernel(%arg0: memref<16x256xf32, #tpu.memory_space<vmem>>, %arg1: memref<16x1xf32, #tpu.memory_space<vmem>>) attributes {dimension_semantics = [], scalar_prefetch = 0 : i64, scratch_operands = 0 : i64, tpu.core_type = #tpu.core_type<tc>} {
    %c0 = arith.constant 0 : index
    %c0_0 = arith.constant 0 : index
    %0 = vector.load %arg0[%c0, %c0_0] : memref<16x256xf32, #tpu.memory_space<vmem>>, vector<16x256xf32>
    %cst = arith.constant dense<0.000000e+00> : vector<16xf32>
    %1 = vector.multi_reduction <add>, %0, %cst [1] : vector<16x256xf32> to vector<16xf32>
    %2 = vector.shape_cast %1 : vector<16xf32> to vector<16x1xf32>
    %cst_1 = arith.constant 2.560000e+02 : f32
    %3 = vector.broadcast %cst_1 : f32 to vector<16x1xf32>
    %4 = arith.divf %2, %3 : vector<16x1xf32>
    %c0_2 = arith.constant 0 : index
    %c0_3 = arith.constant 0 : index
    %5 = vector.load %arg1[%c0_2, %c0_3] : memref<16x1xf32, #tpu.memory_space<vmem>>, vector<16x1xf32>
    tpu.vector_store %arg1[%c0_2, %c0_3], %4 {strides = array<i32>} : memref<16x1xf32, #tpu.memory_space<vmem>>, vector<16x1xf32>,
    return
  }
}

module attributes {stable_mosaic.version = 11 : i64} {
  func.func @_linear_kernel(%arg0: memref<2x8xf32, #tpu.memory_space<vmem>>, %arg1: memref<8x10xf32, #tpu.memory_space<vmem>>, %arg2: memref<1x10xf32, #tpu.memory_space<vmem>>, %arg3: memref<2x10xf32, #tpu.memory_space<vmem>>) attributes {dimension_semantics = [], scalar_prefetch = 0 : i64, scratch_operands = 0 : i64, tpu.core_type = #tpu.core_type<tc>} {
    %c0 = arith.constant 0 : index
    %c0_0 = arith.constant 0 : index
    %0 = vector.load %arg0[%c0, %c0_0] : memref<2x8xf32, #tpu.memory_space<vmem>>, vector<2x8xf32>
    %c0_1 = arith.constant 0 : index
    %c0_2 = arith.constant 0 : index
    %1 = vector.load %arg1[%c0_1, %c0_2] : memref<8x10xf32, #tpu.memory_space<vmem>>, vector<8x10xf32>
    %cst = arith.constant dense<0.000000e+00> : vector<2x10xf32>
    %2 = tpu.matmul %0, %1, %cst {dimension_numbers = #tpu.dot_dimension_numbers<[1], [0], [0], [1], [0, 0, 1, 1], [], []>} : vector<2x8xf32>, vector<8x10xf32>, vector<2x10xf32> -> vector<2x10xf32>
    %c0_3 = arith.constant 0 : index
    %c0_4 = arith.constant 0 : index
    %3 = vector.load %arg2[%c0_3, %c0_4] : memref<1x10xf32, #tpu.memory_space<vmem>>, vector<1x10xf32>
    %4 = vector.broadcast %3 : vector<1x10xf32> to vector<2x10xf32>
    %5 = arith.addf %2, %4 : vector<2x10xf32>
    %c0_5 = arith.constant 0 : index
    %c0_6 = arith.constant 0 : index
    %6 = vector.load %arg3[%c0_5, %c0_6] : memref<2x10xf32, #tpu.memory_space<vmem>>, vector<2x10xf32>
    tpu.vector_store %arg3[%c0_5, %c0_6], %5 {strides = array<i32>} : memref<2x10xf32, #tpu.memory_space<vmem>>, vector<2x10xf32>,
    return
  }
}

</mosaic_0001>

<bundles_post_ra>
// kernel: _forward_impl.6
= control target key start
LH: loop header
LB: loop body
LE: loop exit
PB: predicated region body
PF: predicated region fallthrough
CT: control target
= control target key end

     0   :  { %v48_v0 = vmov 0   ;;  %s99_s1 = inlined_call_operand.vmem [shape: f32[8,1], index: 1, kind: input, shape index: {}]   ;;  %s100_s2 = inlined_call_operand.vmem [shape: f32[8,1], index: 2, kind: input, shape index: {}]   ;;  %s101_s0 = inlined_call_operand.vmem [shape: f32[8,512], index: 0, kind: input, shape index: {}]   ;;  %s102_s3 = inlined_call_operand.vmem [shape: f32[8,512], index: 3, kind: output, shape index: {}]  }
   0x1   :  { %47 = vset.pattern.permute.xlu0 %v48_v0  ;;  %v18_v1 = vld [vmem:[%s99_s1] sm:$0xff]  ;;  %v15_v5 = vld [vmem:[%s101_s0 + $0x8] sm:$0xff]  ;;  %v16_v6 = vld [vmem:[%s101_s0 + $0x10] sm:$0xff] }
   0x2   :  { %21 = vperm.xlu0 %47, %v18_v1   ;;  %v28_v2 = vld [vmem:[%s100_s2] sm:$0xff]  ;;  %v17_v7 = vld [vmem:[%s101_s0 + $0x18] sm:$0xff] }
   0x3   :  { %v14_v4 = vld [vmem:[%s101_s0] sm:$0xff] }
   0xa   :  { %31 = vperm.xlu0 %47, %v28_v2  }
  0x74   :  { %v22_v3 = vpop.permute.xlu0 %21 }
  0x75   :  { %v24_v8 = vmul.f32 %v22_v3, %v14_v4  ;;  %v25_v9 = vmul.f32 %v22_v3, %v15_v5  ;;  %v26_v10 = vmul.f32 %v22_v3, %v16_v6  ;;  %v27_v12 = vmul.f32 %v22_v3, %v17_v7 }
  0x7c   :  { %v32_v11 = vpop.permute.xlu0 %31 }
  0x7d   :  { %v34_v13 = vadd.f32 %v32_v11, %v24_v8  ;;  %v35_v14 = vadd.f32 %v32_v11, %v25_v9  ;;  %v36_v15 = vadd.f32 %v32_v11, %v26_v10  ;;  %v37_v16 = vadd.f32 %v32_v11, %v27_v12 }
  0x7f   :  { %38 = vst [vmem:[%s102_s3] sm:$0xff] %v34_v13 }
  0x80   :  { %39 = vst [vmem:[%s102_s3 + $0x8] sm:$0xff] %v35_v14 }
  0x81   :  { %40 = vst [vmem:[%s102_s3 + $0x10] sm:$0xff] %v36_v15 }
  0x82   :  { %41 = vst [vmem:[%s102_s3 + $0x18] sm:$0xff] %v37_v16 }

// kernel: _forward_impl.5
= control target key start
LH: loop header
LB: loop body
LE: loop exit
PB: predicated region body
PF: predicated region fallthrough
CT: control target
= control target key end

     0   :  { %s391_s9 = smov 0   ;;  %s393_s10 = smov 0   ;;  %s446_s0 = inlined_call_operand.vmem [shape: f32[8,36], index: 0, kind: input, shape index: {}]   ;;  %s447_s1 = inlined_call_operand.vmem [shape: f32[36,512], index: 1, kind: input, shape index: {}]   ;;  %s448_s2 = inlined_call_operand.vmem [shape: f32[8,512], index: 2, kind: output, shape index: {}]  }
   0x1   :  { %s395_s11 = smov 0  }
   0x2 LB: > { %s310_s12 = sadd.s32 4294967295, %s374_s11   ;;  %s408_s13 = sadd.s32 1, %s374_s11   ;;  %s374_s11 = sphi %s395_s11, %s451_s11   ;;  %s370_s10 = sphi %s393_s10, %s450_s10   ;;  %s366_s9 = sphi %s391_s9, %s449_s9  }
   0x3   : > { %s37_s14 = ssub.s32 %s374_s11, %s408_s13  ;;  %s40_s15 = sadd.s32 1, %s370_s10 }
   0x4   : > { %p38_p0 = scmp.eq.s32.totalorder %s37_s14, 0  ;;  %p47_p1 = scmp.ne.s32.totalorder %s370_s10, %s366_s9 }
   0x5   : > { %p48_p2 = scmp.eq.s32.totalorder %s374_s11, 0  ;;  %p313_p4 = scmp.ge.s32.totalorder %s374_s11, 2 }
   0x6   : > { %s417_s16 = scalar_select %p38_p0, %s370_s10, %s40_s15  }
   0x7   : > { %p49_p3 = por %p48_p2, %p47_p1  ;;  %102 = sbr.rel (%p313_p4) target bundleno = 26 (0x1a), region = 20 }
   0xc   : > { %105 = sbr.rel (!%p49_p3) target bundleno = 26 (0x1a), region = 24  ;;  %s107_s17 = sand.u32 (%p49_p3), 1, %s370_s10  }
   0xd   : > { %s325_s18 = sshll.u32 (%p49_p3), %s374_s11, 4  ;;  %s326_s19 = smul.u32 (%p49_p3), 80, %s107_s17 }
   0xe   : > { %s112_s22 = scalar_lea.vmem (%p49_p3), %s447_s1, %s325_s18 }
   0xf   : > { %v125_v0 = vld [vmem:[%s112_s22] sm:$0xff] (%p49_p3)  ;;  %v127_v1 = vld [vmem:[%s112_s22 + $0x8] sm:$0xff] (%p49_p3)  ;;  %s109_s23 = scalar_lea.vmem (%p49_p3), [#allocation2], %s326_s19 }
  0x10   : > { %v129_v2 = vld [vmem:[%s112_s22 + $0x20] sm:$0xff] (%p49_p3)  ;;  %126 = vst [vmem:[%s109_s23] sm:$0xff] (%p49_p3), %v125_v0  ;;  %v131_v3 = vld [vmem:[%s112_s22 + $0x28] sm:$0xff] (%p49_p3) }
  0x11   : > { %128 = vst [vmem:[%s109_s23 + $0x8] sm:$0xff] %v127_v1  ;;  %v133_v4 = vld [vmem:[%s112_s22 + $0x40] sm:$0xff]  ;;  %v135_v5 = vld [vmem:[%s112_s22 + $0x48] sm:$0xff] }
  0x12   : > { %130 = vst [vmem:[%s109_s23 + $0x10] sm:$0xff] %v129_v2  ;;  %v137_v6 = vld [vmem:[%s112_s22 + $0x60] sm:$0xff]  ;;  %v139_v7 = vld [vmem:[%s112_s22 + $0x68] sm:$0xff] }
  0x13   : > { %132 = vst [vmem:[%s109_s23 + $0x18] sm:$0xff] %v131_v3  ;;  %v141_v8 = vld [vmem:[%s112_s22 + $0x80] sm:$0xff]  ;;  %v143_v9 = vld [vmem:[%s112_s22 + $0x88] sm:$0xff] }
  0x14   : > { %134 = vst [vmem:[%s109_s23 + $0x20] sm:$0xff] %v133_v4 }
  0x15   : > { %136 = vst [vmem:[%s109_s23 + $0x28] sm:$0xff] %v135_v5 }
  0x16   : > { %138 = vst [vmem:[%s109_s23 + $0x30] sm:$0xff] %v137_v6 }
  0x17   : > { %140 = vst [vmem:[%s109_s23 + $0x38] sm:$0xff] %v139_v7 }
  0x18   : > { %142 = vst [vmem:[%s109_s23 + $0x40] sm:$0xff] %v141_v8 }
  0x19   : > { %144 = vst [vmem:[%s109_s23 + $0x48] sm:$0xff] %v143_v9 }
  0x1a PF: > { %p316_p5 = scmp.ge.s32.totalorder %s374_s11, 1  ;;  %p149_p6 = scmp.lt.s32.totalorder %s374_s11, 3 }
  0x1c   : > { %p150_p7 = pnand %p316_p5, %p149_p6 }
  0x1d   : > { %s156_s24 = sand.u32 (!%p150_p7), 1, %s366_s9   ;;  %s317_s29 = sshll.u32 (!%p150_p7), %s310_s12, 1 }
  0x1e   : > { %153 = sbr.rel (%p150_p7) target bundleno = 173 (0xad), region = 47  ;;  %p179_p8 = scmp.lt.s32.totalorder (!%p150_p7), %s317_s29, 3 }
  0x1f   : > { %s327_s25 = smul.u32 (!%p150_p7), 80, %s156_s24 }
  0x21   : > { %s158_s26 = scalar_lea.vmem (!%p150_p7), [#allocation2], %s327_s25 }
  0x23   : > { %vm199_vm0 = vcmask 1043456   ;;  %v193_v10 = vld [vmem:[%s158_s26 + $0x40] sm:$0xf]  ;;  %v194_v11 = vld [vmem:[%s158_s26 + $0x48] sm:$0xf]  ;;  %v191_v12 = vld [vmem:[%s158_s26 + $0x30] sm:$0xff] }
  0x24   : > { %319 = vmatpush.msk.msra.mxu0 %vm199_vm0, %v193_v10  ;;  %321 = vmatpush.msk.msra.mxu1 %vm199_vm0, %v194_v11  ;;  %v192_v13 = vld [vmem:[%s158_s26 + $0x38] sm:$0xff]  ;;  %v189_v14 = vld [vmem:[%s158_s26 + $0x20] sm:$0xff]  ;;  %v190_v15 = vld [vmem:[%s158_s26 + $0x28] sm:$0xff]  ;;  %vm195_vm1 = vcmask 293888   ;;  %s453_s29 = smov (!%p179_p8, %s317_s29), 3 }
  0x25   : > { %v187_v16 = vld [vmem:[%s158_s26 + $0x10] sm:$0xff]  ;;  %v188_v17 = vld [vmem:[%s158_s26 + $0x18] sm:$0xff]  ;;  %v185_v18 = vld [vmem:[%s158_s26] sm:$0xff]  ;;  %s318_s30 = sshll.u32 %s453_s29, 3 }
  0x26   : > { %218 = vmatpush.msra.mxu0 %v191_v12  ;;  %238 = vmatpush.msra.mxu1 %v192_v13  ;;  %v186_v19 = vld [vmem:[%s158_s26 + $0x8] sm:$0xff]  ;;  %v184_v20 = vld [vmem:[%s446_s0] sm:$0xff]  ;;  %s182_s5 = scalar_lea.vmem %s448_s2, %s318_s30 }
  0x28   : > { %219 = vmatpush.msra.mxu0 %v189_v14  ;;  %239 = vmatpush.msra.mxu1 %v190_v15 }
  0x2a   : > { %220 = vmatpush.msra.mxu0 %v187_v16  ;;  %240 = vmatpush.msra.mxu1 %v188_v17 }
  0x2c   : > { %221 = vmatpush.msra.mxu0 %v185_v18  ;;  %241 = vmatpush.msra.mxu1 %v186_v19 }
  0x2d   : > { %320 = vmatmul.msk.f32.vlgmr.msra.gmra.mxu0 %vm195_vm1, %v184_v20  ;;  %322 = vmatmul.msk.f32.vlgmr.msra.gmra.mxu1 %vm195_vm1, %v184_v20 }
  0xaa   : > { %v223_v21 = vpop.f32.mrf.mxu0  ;;  %v243_v22 = vpop.f32.mrf.mxu1 }
  0xab   : > { %246 = vst [vmem:[%s182_s5] sm:$0xff] %v223_v21 }
  0xac   : > { %247 = vst [vmem:[%s182_s5 + $0x8] sm:$0xff] %v243_v22 }
  0xad PF: > { %p9_p9 = scmp.ge.s32.totalorder %s408_s13, 4   ;;  %s449_s9 = smov %s370_s10 }
  0xae   : > { %s450_s10 = smov %s417_s16  ;;  %s451_s11 = smov %s408_s13 }
  0xaf   :  { %11 = sbr.rel (!%p9_p9) target bundleno = 2 (0x2), region = 86 }

// kernel: _forward_impl.7
= control target key start
LH: loop header
LB: loop body
LE: loop exit
PB: predicated region body
PF: predicated region fallthrough
CT: control target
= control target key end

     0   :  { %s58_s0 = inlined_call_operand.vmem [shape: f32[16,256], index: 0, kind: input, shape index: {}]   ;;  %s59_s1 = inlined_call_operand.vmem [shape: f32[16,256], index: 1, kind: output, shape index: {}]  }
   0x1   :  { %v8_v0 = vld [vmem:[%s58_s0] sm:$0xff]  ;;  %v9_v1 = vld [vmem:[%s58_s0 + $0x8] sm:$0xff]  ;;  %v10_v2 = vld [vmem:[%s58_s0 + $0x10] sm:$0xff] }
   0x2   :  { %v12_v3 = vmax.f32 %v8_v0, 0.0  ;;  %v13_v4 = vmax.f32 %v9_v1, 0.0  ;;  %v14_v5 = vmax.f32 %v10_v2, 0.0  ;;  %v11_v6 = vld [vmem:[%s58_s0 + $0x18] sm:$0xff] }
   0x3   :  { %v15_v7 = vmax.f32 %v11_v6, 0.0 }
   0x4   :  { %16 = vst [vmem:[%s59_s1] sm:$0xff] %v12_v3 }
   0x5   :  { %17 = vst [vmem:[%s59_s1 + $0x8] sm:$0xff] %v13_v4 }
   0x6   :  { %18 = vst [vmem:[%s59_s1 + $0x10] sm:$0xff] %v14_v5 }
   0x7   :  { %19 = vst [vmem:[%s59_s1 + $0x18] sm:$0xff] %v15_v7 }

// kernel: _forward_impl.8
= control target key start
LH: loop header
LB: loop body
LE: loop exit
PB: predicated region body
PF: predicated region fallthrough
CT: control target
= control target key end

     0   :  { %v37_v6 = vmov 256.0   ;;  %vm27_vm1 = vcmask 7168   ;;  %s66_s0 = inlined_call_operand.vmem [shape: f32[16,256], index: 0, kind: input, shape index: {}]   ;;  %s67_s1 = inlined_call_operand.vmem [shape: f32[16,1], index: 1, kind: output, shape index: {}]  }
   0x1   :  { %v8_v0 = vld [vmem:[%s66_s0] sm:$0xff]  ;;  %v9_v1 = vld [vmem:[%s66_s0 + $0x8] sm:$0xff]  ;;  %v10_v3 = vld [vmem:[%s66_s0 + $0x10] sm:$0xff]  ;;  %35 = vrcp.f32 %v37_v6 }
   0x2   :  { %v12_v2 = vadd.f32 %v9_v1, %v8_v0  ;;  %v11_v4 = vld [vmem:[%s66_s0 + $0x18] sm:$0xff] }
   0x3   :  { %v15_v5 = vadd.f32 %v11_v4, %v10_v3 }
   0x4   :  { %13 = vadd.xlane.f32.xlu0 %v12_v2 }
   0x7   :  { %v36_v7 = vpop.eup %35 }
   0x8   :  { %v19_v8 = vmul.f32 256.0, %v36_v7  ;;  %vm23_vm0 = vweird.f32 %v36_v7 }
   0xa   :  { %v20_v9 = vsub.f32 1.0, %v19_v8 }
   0xc   :  { %16 = vadd.xlane.f32.xlu0 %v15_v5  ;;  %v21_v10 = vmul.f32 %v36_v7, %v20_v9 }
   0xe   :  { %v22_v11 = vadd.f32 %v36_v7, %v21_v10 }
  0x10   :  { %v24_v12 = vsel %vm23_vm0, %v36_v7, %v22_v11 }
  0x77   :  { %v14_v13 = vpop.xlane.xlu0 %13 }
  0x78   :  { %v25_v14 = vmul.f32 %v24_v12, %v14_v13 }
  0x7a   :  { %28 = vst.msk [vmem:[%s67_s1] sm:$0xff] %vm27_vm1, %v25_v14 }
  0x7f   :  { %v17_v15 = vpop.xlane.xlu0 %16 }
  0x80   :  { %v26_v16 = vmul.f32 %v24_v12, %v17_v15 }
  0x82   :  { %29 = vst.msk [vmem:[%s67_s1 + $0x8] sm:$0xff] %vm27_vm1, %v26_v16 }

// kernel: _forward_impl.9
= control target key start
LH: loop header
LB: loop body
LE: loop exit
PB: predicated region body
PF: predicated region fallthrough
CT: control target
= control target key end

     0   :  { %vm21_vm0 = vcmask 64512   ;;  %s125_s0 = inlined_call_operand.vmem [shape: f32[2,8], index: 0, kind: input, shape index: {}]   ;;  %s126_s1 = inlined_call_operand.vmem [shape: f32[8,10], index: 1, kind: input, shape index: {}]   ;;  %s127_s2 = inlined_call_operand.vmem [shape: f32[1,10], index: 2, kind: input, shape index: {}]   ;;  %s128_s3 = inlined_call_operand.hbm [shape: f32[2,10], index: 3, kind: output, shape index: {}]  }
   0x1   :  { %v16_v0 = vld [vmem:[%s126_s1] sm:$0xff] }
   0x2   :  { %v15_v1 = vld [vmem:[%s125_s0] sm:$0x3]  ;;  %40 = vmatpush.msra.mxu0 %v16_v0 }
   0x3   :  { %8 = vsyncpa [#allocation3], 0  ;;  %63 = vmatmul.msk.f32.vlgmr.msra.gmra.mxu0 %vm21_vm0, %v15_v1  ;;  %v65_v2 = vld [vmem:[%s127_s2] ss:$0 sm:$0xff]  ;;  %s92_s18 = smov [#allocation2]   ;;  %s54_s22 = sshll.u32 %s128_s3, 4  ;;  %s55_s22 = int_to_ptr.hbm [resolvable:$true] %s54_s22 }
   0x4   :  { %s52_s19 = sshll.u32 %s92_s18, 4  ;;  %vm45_vm1 = vcmask 74752   ;;  %s53_s19 = int_to_ptr.vmem [resolvable:$true] %s52_s19 }
  0x80   :  { %v42_v3 = vpop.f32.mrf.mxu0 }
  0x81   :  { %v43_v4 = vadd.f32 %v65_v2, %v42_v3 }
  0x83   :  { %46 = vst.msk [vmem:[#allocation2] sm:$0x3] %vm45_vm1, %v43_v4 }
  0x84   :  { %57 = dma.vmem_to_hbm [thread:$0]  %s53_s19, 32, %s55_s22, [#allocation3]  }
  0x85   :  { %90 = dma.done.wait [#allocation3], 32  }
  0x86   :  { %91 = vsyncadd [#allocation3], 4294967264 }
  0x87   :  { %62 = vsyncpa [#allocation3], 1 }

</bundles_post_ra>
